<compile_context>
chip_gen: v5e
topology: v5e:2x2
jax: 0.10.0
libtpu: 0.0.40
codegen_flags: <defaults>
</compile_context>

<pallas_src>
import functools

import jax
import jax.numpy as jnp
from jax.experimental import pallas as pl
from jax.experimental.pallas import tpu as pltpu

LANE = 128  # TPU lane width; every feature dimension is zero-padded to this.


def _round_up(x, m):
    return (x + m - 1) // m * m


def _vmem_capacity_bytes():
    """Generation-aware VMEM capacity (v5e/v6e: 128 MiB, v7x: 64 MiB/core)."""
    try:
        return int(pltpu.get_tpu_info().vmem_capacity_bytes)
    except Exception:
        return 64 << 20  # conservative fallback (v7x per-core VMEM)


def _choose_row_tiling(n, vmem_cap):
    """Pick (n_pad, tile_m) for L_hat / X row tiles, generation-aware."""
    n8 = _round_up(max(n, 8), 8)
    if n8 <= 512:
        return n8, n8                       # single row tile for small graphs
    tile_m = 512 if vmem_cap >= (96 << 20) else 256
    return _round_up(n, tile_m), tile_m


def _invariant_spec(block_shape, index_map):
    """BlockSpec for a grid-invariant input: single VMEM buffer if supported."""
    try:
        return pl.BlockSpec(block_shape, index_map,
                            pipeline_mode=pl.Buffered(1))
    except Exception:  # older jax without pipeline_mode / Buffered
        return pl.BlockSpec(block_shape, index_map)


def _clamp_vmem_limit(est_bytes, vmem_cap):
    limit = int(1.4 * est_bytes) + (4 << 20)
    limit = max(limit, 32 << 20)
    return min(limit, int(vmem_cap * 0.9))


# ---------------------------------------------------------------------------
# Kernel A: Chebyshev recurrence -> bf16 T-slab [N, (K-1)*128]
#   grid = (K-1, row_tiles); step j computes T_{j+1} for one row tile.
#   tprev_ref: 2-plane bf16 ring buffer holding T_j / T_{j-1} for ALL rows
#   (shared by every row tile => both grid axes stay on one core).
# ---------------------------------------------------------------------------

def cheb_recurrence_kernel(lhat_ref, x_ref, t_out_ref, tprev_ref, *,
                           tile_m, lhat_resident):
    j = pl.program_id(0)
    i = pl.program_id(1)
    row0 = pl.multiple_of(i * tile_m, tile_m)
    rows = pl.ds(row0, tile_m)

    if lhat_resident:
        lhat_rows = lhat_ref[rows, :]          # (TM, N) bf16, VMEM-resident
    else:
        lhat_rows = lhat_ref[...]              # (TM, N) bf16 streamed tile

    @pl.when(j == 0)
    def _():
        # Seed ring slot 0 with T_0 = X; compute T_1 = L_hat @ X.
        tprev_ref[0, rows, :] = x_ref[rows, :]
        t1 = jnp.dot(lhat_rows, x_ref[...],
                     preferred_element_type=jnp.float32).astype(jnp.bfloat16)
        tprev_ref[1, rows, :] = t1
        t_out_ref[...] = t1                    # lane-dense complete block

    @pl.when(j >= 1)
    def _():
        # T_{j+1} = 2 L_hat T_j - T_{j-1}; subtraction in f32 on the tile only.
        slot_j = jax.lax.rem(j, 2)             # ring slot holding T_j
        t_prev = tprev_ref[slot_j]             # (N, Fp) bf16, all rows
        t_prev2 = tprev_ref[1 - slot_j, rows, :].astype(jnp.float32)
        t_new = (2.0 * jnp.dot(lhat_rows, t_prev,
                               preferred_element_type=jnp.float32)
                 - t_prev2).astype(jnp.bfloat16)
        tprev_ref[1 - slot_j, rows, :] = t_new  # overwrite T_{j-1} rows
        t_out_ref[...] = t_new


def _cheb_recurrence(lhat_bf16, x_bf16, *, K, tile_m, vmem_cap):
    n_pad, fin_pad = x_bf16.shape
    n_tiles = n_pad // tile_m

    base = (n_pad * fin_pad * 2            # resident X (bf16, single buffer)
            + 2 * n_pad * fin_pad * 2      # 2-plane T ring scratch (bf16)
            + 2 * tile_m * fin_pad * 2     # output blocks (double buffered)
            + 2 * tile_m * fin_pad * 4)    # f32 matmul result temporaries
    resident_est = base + n_pad * n_pad * 2 + tile_m * n_pad * 2  # + row slice
    streamed_est = base + 2 * tile_m * n_pad * 2
    lhat_resident = (int(1.4 * resident_est) + (4 << 20)
                     <= int(vmem_cap * 0.85))
    est = resident_est if lhat_resident else streamed_est
    vmem_limit = _clamp_vmem_limit(est, vmem_cap)

    if lhat_resident:
        # Resident fast path: avoids re-streaming (N, N) L_hat (K-1)x from HBM.
        lhat_spec = _invariant_spec((n_pad, n_pad), lambda j, i: (0, 0))
    else:
        lhat_spec = pl.BlockSpec((tile_m, n_pad), lambda j, i: (i, 0))

    kernel = functools.partial(cheb_recurrence_kernel, tile_m=tile_m,
                               lhat_resident=lhat_resident)
    return pl.pallas_call(
        kernel,
        out_shape=jax.ShapeDtypeStruct((n_pad, (K - 1) * fin_pad),
                                       jnp.bfloat16),
        grid_spec=pltpu.PrefetchScalarGridSpec(
            num_scalar_prefetch=0,
            grid=(K - 1, n_tiles),
            in_specs=[lhat_spec,
                      _invariant_spec((n_pad, fin_pad), lambda j, i: (0, 0))],
            out_specs=pl.BlockSpec((tile_m, fin_pad), lambda j, i: (i, j)),
            scratch_shapes=[pltpu.VMEM((2, n_pad, fin_pad), jnp.bfloat16)],
        ),
        compiler_params=pltpu.CompilerParams(
            # The full-N T ring scratch is shared by every row tile, so both
            # grid axes must stay on a single core.
            dimension_semantics=("arbitrary", "arbitrary"),
            vmem_limit_bytes=vmem_limit,
        ),
    )(lhat_bf16, x_bf16)


# ---------------------------------------------------------------------------
# Kernel B: fused projection  y = sum_k T_k @ W_k + b  (+ReLU)
#   grid = (row_tiles,), fully parallel -> megacore on v7x.
# ---------------------------------------------------------------------------

def cheb_project_kernel(*refs, K, fin_pad, apply_relu):
    if K >= 2:
        x_ref, t_ref, w_ref, b_ref, y_ref = refs
    else:
        x_ref, w_ref, b_ref, y_ref = refs
    # T_0 = X term (bf16 x bf16 MXU, f32 accumulation).
    acc = jnp.dot(x_ref[...], w_ref[0], preferred_element_type=jnp.float32)
    for k in range(1, K):                            # static unroll
        t_k = t_ref[:, (k - 1) * fin_pad:k * fin_pad]  # static lane slice
        acc = acc + jnp.dot(t_k, w_ref[k],
                            preferred_element_type=jnp.float32)
    y = acc + b_ref[...]
    if apply_relu:
        y = jnp.maximum(y, 0.0)
    y_ref[...] = y.astype(y_ref.dtype)               # lane-dense store


def _cheb_project(x_bf16, t_slab, w_bf16, b_f32, *, apply_relu, tile_m,
                  out_dtype, vmem_cap):
    n_pad, fin_pad = x_bf16.shape
    K, _, fout_pad = w_bf16.shape
    n_tiles = n_pad // tile_m

    in_specs = [pl.BlockSpec((tile_m, fin_pad), lambda i: (i, 0))]
    args = [x_bf16]
    if K >= 2:
        in_specs.append(
            pl.BlockSpec((tile_m, (K - 1) * fin_pad), lambda i: (i, 0)))
        args.append(t_slab)
    in_specs += [_invariant_spec((K, fin_pad, fout_pad), lambda i: (0, 0, 0)),
                 _invariant_spec((1, fout_pad), lambda i: (0, 0))]
    args += [w_bf16, b_f32]

    est = (2 * tile_m * K * fin_pad * 2          # x + T slab tiles (x2 bufs)
           + K * fin_pad * fout_pad * 2          # weights (single buffer)
           + 8 * fout_pad * 4                    # bias
           + 2 * tile_m * fout_pad * 4           # f32 accumulator temps
           + 2 * tile_m * fout_pad * jnp.dtype(out_dtype).itemsize)
    vmem_limit = _clamp_vmem_limit(est, vmem_cap)

    kernel = functools.partial(cheb_project_kernel, K=K, fin_pad=fin_pad,
                               apply_relu=apply_relu)
    return pl.pallas_call(
        kernel,
        out_shape=jax.ShapeDtypeStruct((n_pad, fout_pad), out_dtype),
        grid_spec=pltpu.PrefetchScalarGridSpec(
            num_scalar_prefetch=0,
            grid=(n_tiles,),
            in_specs=in_specs,
            out_specs=pl.BlockSpec((tile_m, fout_pad), lambda i: (i, 0)),
        ),
        compiler_params=pltpu.CompilerParams(
            dimension_semantics=("parallel",),   # row tiles independent
            vmem_limit_bytes=vmem_limit,
        ),
    )(*args)


def cheb_conv_layer(lhat_bf16, x_bf16, w_bf16, b_f32, *, apply_relu, tile_m,
                    vmem_cap, out_dtype):
    K = w_bf16.shape[0]
    t_slab = None
    if K >= 2:
        t_slab = _cheb_recurrence(lhat_bf16, x_bf16, K=K, tile_m=tile_m,
                                  vmem_cap=vmem_cap)
    return _cheb_project(x_bf16, t_slab, w_bf16, b_f32,
                         apply_relu=apply_relu, tile_m=tile_m,
                         out_dtype=out_dtype, vmem_cap=vmem_cap)


# ---------------------------------------------------------------------------
# Kernel C: tiled global_max_pool + Linear
#   grid over row tiles; (B_pad, H) f32 scratch; classifier matmul at the end.
# ---------------------------------------------------------------------------

def pool_classify_kernel(batch_ref, x_ref, w_ref, b_ref, o_ref, pooled_ref, *,
                         num_graphs):
    i = pl.program_id(0)
    fill = jnp.finfo(jnp.float32).min                     # not -inf

    @pl.when(i == 0)
    def _():
        pooled_ref[...] = jnp.full_like(pooled_ref, fill)

    x = x_ref[...]                                        # (TM, Hp) f32
    bids = batch_ref[...]                                 # (1, TM) i32
    b_pad = pooled_ref.shape[0]
    gids = jax.lax.broadcasted_iota(jnp.int32, (b_pad, bids.shape[1]), 0)
    mask = bids == gids                                   # (Bp, TM)
    masked = jnp.where(mask[:, :, None], x[None, :, :], fill)
    pooled_ref[...] = jnp.maximum(pooled_ref[...], jnp.max(masked, axis=1))

    @pl.when(i == pl.num_programs(0) - 1)
    def _():
        # Zero padded-graph rows so the final matmul stays finite.
        rows = jax.lax.broadcasted_iota(jnp.int32, pooled_ref.shape, 0)
        pooled = jnp.where(rows < num_graphs, pooled_ref[...], 0.0)
        o_ref[...] = (jnp.dot(pooled, w_ref[...],
                              preferred_element_type=jnp.float32)
                      + b_ref[...])


def pool_and_classify(batch_2d, x_pad, w_pad, b_pad_, num_graphs, *, tile_m,
                      vmem_cap):
    n_pad, h_pad = x_pad.shape
    c_pad = w_pad.shape[1]
    b_rows = _round_up(max(num_graphs, 8), 8)
    n_tiles = n_pad // tile_m

    est = (b_rows * tile_m * h_pad * 4          # masked broadcast temporary
           + 2 * tile_m * h_pad * 4             # x tiles
           + 2 * 8 * tile_m * 4                 # batch-id tiles
           + h_pad * c_pad * 4 + 8 * c_pad * 4  # classifier weights / bias
           + b_rows * h_pad * 4                 # pooled scratch
           + 2 * b_rows * c_pad * 4)            # output
    vmem_limit = _clamp_vmem_limit(est, vmem_cap)

    kernel = functools.partial(pool_classify_kernel, num_graphs=num_graphs)
    return pl.pallas_call(
        kernel,
        out_shape=jax.ShapeDtypeStruct((b_rows, c_pad), jnp.float32),
        grid_spec=pltpu.PrefetchScalarGridSpec(
            num_scalar_prefetch=0,
            grid=(n_tiles,),
            in_specs=[
                pl.BlockSpec((1, tile_m), lambda i: (0, i)),      # batch ids
                pl.BlockSpec((tile_m, h_pad), lambda i: (i, 0)),  # hidden
                _invariant_spec((h_pad, c_pad), lambda i: (0, 0)),
                _invariant_spec((1, c_pad), lambda i: (0, 0)),
            ],
            out_specs=pl.BlockSpec((b_rows, c_pad), lambda i: (0, 0)),
            scratch_shapes=[pltpu.VMEM((b_rows, h_pad), jnp.float32)],
        ),
        compiler_params=pltpu.CompilerParams(
            dimension_semantics=("arbitrary",),   # shared pooled scratch
            vmem_limit_bytes=vmem_limit,
        ),
    )(batch_2d, x_pad, w_pad, b_pad_)


# ---------------------------------------------------------------------------
# Forward pass
# ---------------------------------------------------------------------------

def graphcheb_forward(packed, lhat_bf16, x_bf16, batch_2d, num_graphs, *,
                      tile_m, vmem_cap):
    h = x_bf16
    n_layers = len(packed["cheb_w"])
    for li in range(n_layers):
        last = li == n_layers - 1
        h = cheb_conv_layer(lhat_bf16, h, packed["cheb_w"][li],
                            packed["cheb_b"][li],
                            apply_relu=not last, tile_m=tile_m,
                            vmem_cap=vmem_cap,
                            out_dtype=jnp.float32 if last else jnp.bfloat16)
    # F.dropout(p=0.2) is the identity in eval mode.
    # TODO(synk): stochastic dropout via pltpu.prng_random_bits if
    # training-mode semantics are ever required.
    return pool_and_classify(batch_2d, h, packed["lin_w"], packed["lin_b"],
                             num_graphs, tile_m=tile_m, vmem_cap=vmem_cap)


# ---------------------------------------------------------------------------
# Plain-JAX glue: graph construction, parameter init / packing, reference
# ---------------------------------------------------------------------------

def build_scaled_laplacian(edge_src, edge_dst, num_nodes, lambda_max=2.0):
    """Dense L_hat = 2 (I - D^{-1/2} A D^{-1/2}) / lambda_max - I."""
    A = jnp.zeros((num_nodes, num_nodes), jnp.float32)
    A = A.at[edge_src, edge_dst].set(1.0)
    deg = A.sum(axis=1)
    d_inv_sqrt = jnp.where(deg > 0, 1.0 / jnp.sqrt(deg), 0.0)
    A_norm = d_inv_sqrt[:, None] * A * d_inv_sqrt[None, :]
    L = jnp.eye(num_nodes, dtype=jnp.float32) - A_norm
    return (2.0 / lambda_max) * L - jnp.eye(num_nodes, dtype=jnp.float32)


def init_params(key, num_node_features, hidden_channels, K, layers_nr,
                num_classes):
    keys = jax.random.split(key, 2 * layers_nr + 2)
    cheb_w, cheb_b = [], []
    fin = num_node_features
    for li in range(layers_nr):
        cheb_w.append(0.1 * jax.random.normal(
            keys[2 * li], (K, fin, hidden_channels), jnp.float32))
        cheb_b.append(0.1 * jax.random.normal(
            keys[2 * li + 1], (hidden_channels,), jnp.float32))
        fin = hidden_channels
    lin_w = 0.1 * jax.random.normal(
        keys[-2], (hidden_channels, num_classes), jnp.float32)
    lin_b = 0.1 * jax.random.normal(keys[-1], (num_classes,), jnp.float32)
    return {"cheb_w": cheb_w, "cheb_b": cheb_b,
            "lin_w": lin_w, "lin_b": lin_b}


def pack_params(params):
    """Zero-pad torch-layout params into the lane-dense bf16 kernel layout."""
    packed = {"cheb_w": [], "cheb_b": []}
    for w, b in zip(params["cheb_w"], params["cheb_b"]):
        K, fin, fout = w.shape
        fin_p, fout_p = _round_up(fin, LANE), _round_up(fout, LANE)
        wp = jnp.zeros((K, fin_p, fout_p), jnp.float32).at[:, :fin, :fout].set(w)
        packed["cheb_w"].append(wp.astype(jnp.bfloat16))   # bf16 MXU operands
        packed["cheb_b"].append(
            jnp.zeros((1, fout_p), jnp.float32).at[0, :fout].set(b))
    h, c = params["lin_w"].shape
    h_p, c_p = _round_up(h, LANE), _round_up(c, LANE)
    packed["lin_w"] = jnp.zeros((h_p, c_p), jnp.float32).at[:h, :c].set(
        params["lin_w"])
    packed["lin_b"] = jnp.zeros((1, c_p), jnp.float32).at[0, :c].set(
        params["lin_b"])
    return packed


def reference_forward(lhat, x, params, batch_ids, num_graphs):
    """Pure-JAX f32 reference with identical ChebConv semantics."""
    h = x
    n_layers = len(params["cheb_w"])
    for li in range(n_layers):
        w, b = params["cheb_w"][li], params["cheb_b"][li]
        K = w.shape[0]
        t_pp = h
        out = t_pp @ w[0]
        if K > 1:
            t_p = lhat @ h
            out = out + t_p @ w[1]
            for k in range(2, K):
                t_n = 2.0 * (lhat @ t_p) - t_pp
                out = out + t_n @ w[k]
                t_pp, t_p = t_p, t_n
        out = out + b[None, :]
        h = jnp.maximum(out, 0.0) if li < n_layers - 1 else out
    pooled = jnp.stack([
        jnp.max(jnp.where((batch_ids == g)[:, None], h, -jnp.inf), axis=0)
        for g in range(num_graphs)])
    return pooled @ params["lin_w"] + params["lin_b"][None, :]


if __name__ == "__main__":
    # Small synthetic problem: 2 ring graphs with 8 nodes each.
    num_node_features = 4
    hidden_channels = 32
    K = 3
    layers_nr = 2
    num_classes = 2
    num_graphs = 2
    nodes_per_graph = 8
    N = num_graphs * nodes_per_graph

    key = jax.random.PRNGKey(0)
    k_param, k_x = jax.random.split(key)
    params = init_params(k_param, num_node_features, hidden_channels, K,
                         layers_nr, num_classes)
    x = jax.random.normal(k_x, (N, num_node_features), jnp.float32)

    src, dst = [], []
    for g in range(num_graphs):
        base = g * nodes_per_graph
        for i in range(nodes_per_graph):
            u = base + i
            v = base + (i + 1) % nodes_per_graph
            src += [u, v]
            dst += [v, u]
    edge_src = jnp.asarray(src, jnp.int32)
    edge_dst = jnp.asarray(dst, jnp.int32)

    lhat = build_scaled_laplacian(edge_src, edge_dst, N)
    batch_ids = jnp.repeat(jnp.arange(num_graphs, dtype=jnp.int32),
                           nodes_per_graph)

    # --- pack into the padded, lane-dense, bf16 kernel layout ---------------
    vmem_cap = _vmem_capacity_bytes()
    n_pad, tile_m = _choose_row_tiling(N, vmem_cap)
    fin_pad = _round_up(num_node_features, LANE)

    lhat_bf16 = (jnp.zeros((n_pad, n_pad), jnp.float32)
                 .at[:N, :N].set(lhat).astype(jnp.bfloat16))
    # TODO(synk): on v7x an fp8(e4m3) L_hat stream would halve the dominant
    # HBM bytes; kept bf16 here for cross-generation portability / accuracy.
    x_bf16 = (jnp.zeros((n_pad, fin_pad), jnp.float32)
              .at[:N, :num_node_features].set(x).astype(jnp.bfloat16))
    # Padded nodes get batch id -1 so they never win the max-pool.
    batch_pad = jnp.full((1, n_pad), -1, jnp.int32).at[0, :N].set(batch_ids)

    packed = pack_params(params)

    out_pad = graphcheb_forward(packed, lhat_bf16, x_bf16, batch_pad,
                                num_graphs, tile_m=tile_m, vmem_cap=vmem_cap)
    out_pad = jax.block_until_ready(out_pad)
    out = out_pad[:num_graphs, :num_classes]

    # --- check against a pure-JAX f32 reference -----------------------------
    # Reference uses the same bf16-rounded L_hat / X / Cheb weights (math in
    # f32); remaining deviation comes only from bf16 storage of T / hidden
    # activations inside the kernels.
    ref_params = {
        "cheb_w": [w.astype(jnp.bfloat16).astype(jnp.float32)
                   for w in params["cheb_w"]],
        "cheb_b": params["cheb_b"],
        "lin_w": params["lin_w"],
        "lin_b": params["lin_b"],
    }
    ref = reference_forward(lhat_bf16[:N, :N].astype(jnp.float32),
                            x.astype(jnp.bfloat16).astype(jnp.float32),
                            ref_params, batch_ids, num_graphs)

    assert out.shape == (num_graphs, num_classes)
    assert bool(jnp.all(jnp.isfinite(out)))
    max_diff = float(jnp.max(jnp.abs(out - ref)))
    assert max_diff < 1e-1, f"mismatch vs reference: {max_diff}"
    print("KERNEL_OK")
</pallas_src>

<mosaic_0001>
module attributes {stable_mosaic.version = 11 : i64} {
  func.func @cheb_recurrence_kernel(%arg0: i32, %arg1: i32, %arg2: memref<16x16xbf16, #tpu.memory_space<vmem>>, %arg3: memref<16x128xbf16, #tpu.memory_space<vmem>>, %arg4: memref<16x128xbf16, #tpu.memory_space<vmem>>, %arg5: memref<2x16x128xbf16, #tpu.memory_space<vmem>>) attributes {dimension_semantics = [#tpu.dimension_semantics<arbitrary>, #tpu.dimension_semantics<arbitrary>], iteration_bounds = array<i64: 2, 1>, scalar_prefetch = 0 : i64, scratch_operands = 1 : i64, tpu.core_type = #tpu.core_type<tc>, window_params = [{pipeline_mode = #tpu.pipeline_mode<synchronous>, transform_indices = @transform_0, window_bounds = array<i64: 16, 16>}, {pipeline_mode = #tpu.pipeline_mode<synchronous>, transform_indices = @transform_1, window_bounds = array<i64: 16, 128>}, {transform_indices = @transform_2, window_bounds = array<i64: 16, 128>}]} {
    %c16_i32 = arith.constant 16 : i32
    %0 = arith.muli %arg1, %c16_i32 : i32
    %1 = tpu.assume_multiple %0, 16 : i32
    %2 = arith.index_cast %1 : i32 to index
    %c0 = arith.constant 0 : index
    %3 = vector.load %arg2[%2, %c0] : memref<16x16xbf16, #tpu.memory_space<vmem>>, vector<16x16xbf16>
    %c0_i32 = arith.constant 0 : i32
    %4 = arith.cmpi eq, %arg0, %c0_i32 : i32
    %5 = arith.extui %4 : i1 to i32
    %c0_i32_0 = arith.constant 0 : i32
    %6 = arith.cmpi ne, %5, %c0_i32_0 : i32
    scf.if %6 {
      %10 = arith.index_cast %1 : i32 to index
      %c0_2 = arith.constant 0 : index
      %11 = vector.load %arg3[%10, %c0_2] : memref<16x128xbf16, #tpu.memory_space<vmem>>, vector<16x128xbf16>
      %c0_3 = arith.constant 0 : index
      %12 = arith.index_cast %1 : i32 to index
      %c0_4 = arith.constant 0 : index
      %13 = vector.load %arg5[%c0_3, %12, %c0_4] : memref<2x16x128xbf16, #tpu.memory_space<vmem>>, vector<1x16x128xbf16>
      %14 = vector.shape_cast %13 : vector<1x16x128xbf16> to vector<16x128xbf16>
      %15 = vector.shape_cast %11 : vector<16x128xbf16> to vector<1x16x128xbf16>
      tpu.vector_store %arg5[%c0_3, %12, %c0_4], %15 {strides = array<i32>} : memref<2x16x128xbf16, #tpu.memory_space<vmem>>, vector<1x16x128xbf16>,
      %c0_5 = arith.constant 0 : index
      %c0_6 = arith.constant 0 : index
      %16 = vector.load %arg3[%c0_5, %c0_6] : memref<16x128xbf16, #tpu.memory_space<vmem>>, vector<16x128xbf16>
      %cst = arith.constant dense<0.000000e+00> : vector<16x128xf32>
      %17 = tpu.matmul %3, %16, %cst {dimension_numbers = #tpu.dot_dimension_numbers<[1], [0], [0], [1], [0, 0, 1, 1], [], []>} : vector<16x16xbf16>, vector<16x128xbf16>, vector<16x128xf32> -> vector<16x128xf32>
      %18 = arith.truncf %17 : vector<16x128xf32> to vector<16x128xbf16>
      %c1 = arith.constant 1 : index
      %19 = arith.index_cast %1 : i32 to index
      %c0_7 = arith.constant 0 : index
      %20 = vector.load %arg5[%c1, %19, %c0_7] : memref<2x16x128xbf16, #tpu.memory_space<vmem>>, vector<1x16x128xbf16>
      %21 = vector.shape_cast %20 : vector<1x16x128xbf16> to vector<16x128xbf16>
      %22 = vector.shape_cast %18 : vector<16x128xbf16> to vector<1x16x128xbf16>
      tpu.vector_store %arg5[%c1, %19, %c0_7], %22 {strides = array<i32>} : memref<2x16x128xbf16, #tpu.memory_space<vmem>>, vector<1x16x128xbf16>,
      %c0_8 = arith.constant 0 : index
      %c0_9 = arith.constant 0 : index
      %23 = vector.load %arg4[%c0_8, %c0_9] : memref<16x128xbf16, #tpu.memory_space<vmem>>, vector<16x128xbf16>
      tpu.vector_store %arg4[%c0_8, %c0_9], %18 {strides = array<i32>} : memref<16x128xbf16, #tpu.memory_space<vmem>>, vector<16x128xbf16>,
    } else {
    }
    %c1_i32 = arith.constant 1 : i32
    %7 = arith.cmpi sge, %arg0, %c1_i32 : i32
    %8 = arith.extui %7 : i1 to i32
    %c0_i32_1 = arith.constant 0 : i32
    %9 = arith.cmpi ne, %8, %c0_i32_1 : i32
    scf.if %9 {
      %c2_i32 = arith.constant 2 : i32
      %10 = arith.remsi %arg0, %c2_i32 : i32
      %11 = arith.index_cast %10 : i32 to index
      %c0_2 = arith.constant 0 : index
      %c0_3 = arith.constant 0 : index
      %12 = vector.load %arg5[%11, %c0_2, %c0_3] : memref<2x16x128xbf16, #tpu.memory_space<vmem>>, vector<1x16x128xbf16>
      %13 = vector.shape_cast %12 : vector<1x16x128xbf16> to vector<16x128xbf16>
      %c1_i32_4 = arith.constant 1 : i32
      %14 = arith.subi %c1_i32_4, %10 : i32
      %15 = arith.index_cast %14 : i32 to index
      %16 = arith.index_cast %1 : i32 to index
      %c0_5 = arith.constant 0 : index
      %17 = vector.load %arg5[%15, %16, %c0_5] : memref<2x16x128xbf16, #tpu.memory_space<vmem>>, vector<1x16x128xbf16>
      %18 = vector.shape_cast %17 : vector<1x16x128xbf16> to vector<16x128xbf16>
      %19 = arith.extf %18 : vector<16x128xbf16> to vector<16x128xf32>
      %cst = arith.constant dense<0.000000e+00> : vector<16x128xf32>
      %20 = tpu.matmul %3, %13, %cst {dimension_numbers = #tpu.dot_dimension_numbers<[1], [0], [0], [1], [0, 0, 1, 1], [], []>} : vector<16x16xbf16>, vector<16x128xbf16>, vector<16x128xf32> -> vector<16x128xf32>
      %cst_6 = arith.constant 2.000000e+00 : f32
      %21 = vector.broadcast %cst_6 : f32 to vector<16x128xf32>
      %22 = arith.mulf %21, %20 : vector<16x128xf32>
      %23 = arith.subf %22, %19 : vector<16x128xf32>
      %24 = arith.truncf %23 : vector<16x128xf32> to vector<16x128xbf16>
      %c1_i32_7 = arith.constant 1 : i32
      %25 = arith.subi %c1_i32_7, %10 : i32
      %26 = arith.index_cast %25 : i32 to index
      %27 = arith.index_cast %1 : i32 to index
      %c0_8 = arith.constant 0 : index
      %28 = vector.load %arg5[%26, %27, %c0_8] : memref<2x16x128xbf16, #tpu.memory_space<vmem>>, vector<1x16x128xbf16>
      %29 = vector.shape_cast %28 : vector<1x16x128xbf16> to vector<16x128xbf16>
      %30 = vector.shape_cast %24 : vector<16x128xbf16> to vector<1x16x128xbf16>
      tpu.vector_store %arg5[%26, %27, %c0_8], %30 {strides = array<i32>} : memref<2x16x128xbf16, #tpu.memory_space<vmem>>, vector<1x16x128xbf16>,
      %c0_9 = arith.constant 0 : index
      %c0_10 = arith.constant 0 : index
      %31 = vector.load %arg4[%c0_9, %c0_10] : memref<16x128xbf16, #tpu.memory_space<vmem>>, vector<16x128xbf16>
      tpu.vector_store %arg4[%c0_9, %c0_10], %24 {strides = array<i32>} : memref<16x128xbf16, #tpu.memory_space<vmem>>, vector<16x128xbf16>,
    } else {
    }
    return
  }
  func.func @transform_0(%arg0: i32, %arg1: i32) -> (i32, i32) {
    %c0_i32 = arith.constant 0 : i32
    %c0_i32_0 = arith.constant 0 : i32
    %c0_i32_1 = arith.constant 0 : i32
    return %c0_i32, %c0_i32_0 : i32, i32
  }
  func.func @transform_1(%arg0: i32, %arg1: i32) -> (i32, i32) {
    %c0_i32 = arith.constant 0 : i32
    %c0_i32_0 = arith.constant 0 : i32
    %c0_i32_1 = arith.constant 0 : i32
    return %c0_i32, %c0_i32_0 : i32, i32
  }
  func.func @transform_2(%arg0: i32, %arg1: i32) -> (i32, i32) {
    %c0_i32 = arith.constant 0 : i32
    return %arg1, %arg0 : i32, i32
  }
}

</mosaic_0001>

<bundles_post_ra>
// kernel: tpu_custom_call.1
= control target key start
LH: loop header
LB: loop body
LE: loop exit
PB: predicated region body
PF: predicated region fallthrough
CT: control target
= control target key end

     0   :  { %7 = vsyncpa [#allocation4], 0  ;;  %s865_s0 = inlined_call_operand.hbm [shape: bf16[16,16], index: 0, kind: input, shape index: {}]   ;;  %s866_s1 = inlined_call_operand.hbm [shape: bf16[16,128], index: 1, kind: input, shape index: {}]   ;;  %s867_s2 = inlined_call_operand.hbm [shape: bf16[16,256], index: 2, kind: output, shape index: {}]  }
   0x1   :  { %8 = vsyncpa [#allocation7], 0 }
   0x2   :  { %9 = vsyncpa [#allocation5], 0 }
   0x3   :  { %11 = vsyncpa [#allocation5 + $0x1], 0  ;;  %s731_s9 = smov 0   ;;  %s733_s10 = smov 0  }
   0x4   :  { %s735_s11 = smov 0   ;;  %s737_s12 = smov 0  }
   0x5   :  { %s739_s13 = smov 0   ;;  %s741_s14 = smov 0  }
   0x6 LB: > { %s409_s15 = sadd.s32 4294967295, %s707_s14   ;;  %s410_s16 = sadd.s32 4294967294, %s707_s14   ;;  %s707_s14 = sphi %s741_s14, %s17_s14   ;;  %s703_s13 = sphi %s739_s13, %s876_s13   ;;  %s699_s12 = sphi %s737_s12, %s875_s12   ;;  %s695_s11 = sphi %s735_s11, %s874_s11   ;;  %s691_s10 = sphi %s733_s10, %s873_s10   ;;  %s687_s9 = sphi %s731_s9, %s872_s9  }
   0x7   : > { %s29_s17 = sadd.s32 1, %s703_s13  ;;  %s80_s18 = sadd.s32 1, %s695_s11 }
   0x8   : > { %p31_p0 = scmp.ge.s32.totalorder %s29_s17, 2  ;;  %p90_p1 = scmp.ne.s32.totalorder %s695_s11, %s691_s10 }
   0x9   : > { %p91_p2 = scmp.eq.s32.totalorder %s409_s15, 1  ;;  %p96_p3 = scmp.ne.s32.totalorder %s691_s10, %s687_s9 }
   0xa   : > { %s878_s17 = smov (%p31_p0, %s29_s17), 0  ;;  %p97_p5 = scmp.eq.s32.totalorder %s410_s16, 1 }
   0xb   : > { %p771_p4 = por %p91_p2, %p90_p1  ;;  %s76_s20 = ssub.s32 %s703_s13, %s878_s17 }
   0xc   : > { %p411_p6 = scmp.ge.s32.totalorder %s707_s14, 1  ;;  %p78_p7 = scmp.eq.s32.totalorder %s76_s20, 0 }
   0xd   : > { %p778_p8 = por %p97_p5, %p96_p3  ;;  %p104_p9 = scmp.lt.s32.totalorder %s707_s14, 3 }
   0xe   : > { %s784_s22 = scalar_select %p78_p7, %s695_s11, %s80_s18  }
   0xf   : > { %p786_p10 = pnand %p411_p6, %p104_p9  ;;  %p790_p11 = scmp.eq.s32.totalorder %s409_s15, 0 }
  0x10   : > { %s115_s27 = sshll.u32 %s865_s0, 4  ;;  %s709_s28 = smov [#allocation3]   ;;  %s116_s27 = int_to_ptr.hbm [resolvable:$true] %s115_s27 }
  0x11   : > { %p490_p12 = pneg %p786_p10  ;;  %s117_s29 = sshll.u32 %s709_s28, 4  ;;  %s118_s29 = int_to_ptr.vmem [resolvable:$true] %s117_s29 }
  0x12   : > { %s129_s4 = sshll.u32 %s866_s1, 4  ;;  %s710_s5 = smov 64   ;;  %s130_s4 = int_to_ptr.hbm [resolvable:$true] %s129_s4 }
  0x13   : > { %p491_p13 = pnand %p790_p11, %p490_p12  ;;  %s711_s6 = smov 4  }
  0x14   : > { %s712_s7 = smov [#allocation6]   ;;  %147 = sbr.rel (%p786_p10) target bundleno = 351 (0x15f), region = 28 }
  0x15   : > { %493 = dma.hbm_to_vmem [thread:$0]  (!%p491_p13), %s116_s27, 128, %s118_s29, [#allocation4], %s710_s5, %s710_s5, %s711_s6  }
  0x16   : > { %s131_s8 = sshll.u32 %s712_s7, 4  ;;  %s132_s8 = int_to_ptr.vmem [resolvable:$true] %s131_s8 }
  0x17   : > { %496 = dma.hbm_to_vmem [thread:$0]  (!%p491_p13), %s130_s4, 128, %s132_s8, [#allocation7], %s710_s5, %s710_s5, %s711_s6  }
  0x19   : > { %674 = dma.done.wait (%p790_p11), [#allocation4], 128  }
  0x1a   : > { %676 = vsyncadd (%p790_p11), [#allocation4], 4294967168 }
  0x1b   : > { %678 = dma.done.wait (%p790_p11), [#allocation7], 128  }
  0x1c   : > { %680 = vsyncadd (%p790_p11), [#allocation7], 4294967168  ;;  %s167_s15 = sand.u32 1, %s691_s10   ;;  %v438_v0 = vld [vmem:[#allocation3] sm:$0xf]  ;;  %p418_p0 = scmp.ne.s32.totalorder %s699_s12, 0 }
  0x1d   : > { %s417_s16 = sshll.u32 %s167_s15, 3  ;;  %v421_v1 = vld [vmem:[#allocation3] sm:$0xf]  ;;  %v449_v2 = vld [vmem:[#allocation3] sm:$0xf0] }
  0x1e   : > { %v450_v3 = vld [vmem:[#allocation3] sm:$0xf0]  ;;  %s817_s18 = scalar_lea.vmem [#allocation8], %s417_s16  ;;  %182 = sbr.rel (%p418_p0) target bundleno = 178 (0xb2), region = 40 }
  0x23   : > { %v185_v4 = vld [vmem:[#allocation6] sm:$0xff]   ;;  %v422_v6 = vor.u32 %v450_v3, %v421_v1  ;;  %vm204_vm0 = vcmask 130048  }
  0x24   : > { %v451_v5 = vld [vmem:[#allocation6] sm:$0xff]  ;;  %189 = vst [vmem:[#allocation2] sm:$0xff] %v185_v4  }
  0x25   : > { %215 = vmatpush.bf16.msra.mxu0 %v451_v5 }
  0x28   : > { %427 = vmatmul.msk.bf16.vlgmr.msra.gmra.mxu0 %vm204_vm0, %v422_v6 }
  0xa5   : > { %v217_v7 = vpop.f32.mrf.mxu0 }
  0xad   : > { %v219_v8 = vpop.f32.mrf.mxu0 }
  0xae   : > { %v458_v9 = vpack.c.bf16 %v219_v8, %v217_v7 }
  0xb0   : > { %479 = vst [vmem:[#allocation2 + $0x8] sm:$0xff] %v458_v9  }
  0xb1   : > { %464 = vst [vmem:[%s817_s18] sm:$0xff] %v458_v9  }
  0xb2 PF: > { %p430_p1 = scmp.lt.s32.totalorder %s699_s12, 1 }
  0xb3   : > { %p235_p2 = scmp.lt.s32.totalorder (!%p430_p1), %s699_s12, 0  ;;  %s236_s20 = ssub.s32 (!%p430_p1), 0, %s699_s12 }
  0xb4   : > { %234 = sbr.rel (%p430_p1) target bundleno = 334 (0x14e), region = 44  ;;  %s431_s23 = smin.u32 (!%p430_p1), %s699_s12, %s236_s20 }
  0xb5   : > { %s238_s24 = sand.u32 (!%p430_p1), 1, %s431_s23  }
  0xb6   : > { %s239_s25 = ssub.s32 (!%p430_p1), 0, %s238_s24 }
  0xb9   : > { %s880_s25 = smov (!%p235_p2, %s239_s25), %s238_s24  ;;  %v439_v11 = vor.u32 %v449_v2, %v438_v0  ;;  %vm266_vm1 = vcmask 130048  }
  0xba   : > { %s452_s26 = sshll.u32 %s880_s25, 3  ;;  %s246_s28 = ssub.s32 1, %s880_s25 }
  0xbb   : > { %s243_s27 = scalar_lea.vmem [#allocation2], %s452_s26  ;;  %s454_s29 = sshll.u32 %s246_s28, 3 }
  0xbc   : > { %v453_v10 = vld [vmem:[%s243_s27] sm:$0xff]  ;;  %s250_s30 = scalar_lea.vmem [#allocation2], %s454_s29 }
  0xbd   : > { %277 = vmatpush.bf16.msra.mxu0 %v453_v10  ;;  %v466_v13 = vld [vmem:[%s250_s30] sm:$0xff]  }
  0xbe   : > { %v467_v14 = vunpack.c.l.bf16 %v466_v13  ;;  %v468_v16 = vunpack.c.h.bf16 %v466_v13 }
  0xc0   : > { %444 = vmatmul.msk.bf16.vlgmr.msra.gmra.mxu0 %vm266_vm1, %v439_v11 }
 0x13d   : > { %v279_v12 = vpop.f32.mrf.mxu0 }
 0x13e   : > { %v284_v15 = vmul.f32 2.0, %v279_v12 }
 0x140   : > { %v286_v19 = vsub.f32 %v284_v15, %v467_v14 }
 0x145   : > { %v281_v17 = vpop.f32.mrf.mxu0 }
 0x146   : > { %v285_v18 = vmul.f32 2.0, %v281_v17 }
 0x148   : > { %v287_v20 = vsub.f32 %v285_v18, %v468_v16 }
 0x14a   : > { %v472_v21 = vpack.c.bf16 %v287_v20, %v286_v19 }
 0x14c   : > { %473 = vst [vmem:[%s250_s30] sm:$0xff] %v472_v21  }
 0x14d   : > { %478 = vst [vmem:[%s817_s18] sm:$0xff] %v472_v21  }
 0x14e PF: > { %s446_s3 = sshll.u32 %s699_s12, 2  ;;  %s309_s7 = sshll.u32 %s817_s18, 4  ;;  %s310_s7 = int_to_ptr.vmem [resolvable:$true] %s309_s7 }
 0x14f   : > { %s308_s6 = scalar_lea.hbm %s867_s2, %s446_s3  ;;  %s295_s16 = scalar_lea.sflag [#allocation5], %s167_s15 }
 0x150   : > { %s311_s8 = sshll.u32 %s308_s6, 4  ;;  %s641_s12 = scalar_lea.hbm %s867_s2, 16  ;;  %s312_s8 = int_to_ptr.hbm [resolvable:$true] %s311_s8 }
 0x151   : > { %s635_s20 = sshra.s32 %s312_s8, 4  ;;  %s636_s20 = int_to_ptr.hbm [resolvable:$true] %s635_s20 }
 0x152   : > { %s637_s23 = scalar_lea.hbm %s636_s20, 8  ;;  %p642_p7 = scmp.lt.s32.totalorder %s636_s20, %s867_s2 }
 0x153   : > { %p638_p3 = scmp.ne.s32.totalorder %s636_s20, %s637_s23  ;;  %p643_p9 = scmp.lt.s32.totalorder %s641_s12, %s637_s23 }
 0x155   : > { %p639_p5 = pnand %p638_p3, %p771_p4  ;;  %p644_p10 = por %p643_p9, %p642_p7 }
 0x157   : > { %p640_p6 = pneg %p639_p5 }
 0x159   : > { %p645_p11 = pnand %p644_p10, %p640_p6 }
 0x15b   : > { %648 = shalt.err (!%p645_p11)
}
 0x15c   : > { %s713_s15 = smov 64   ;;  %s714_s18 = smov 128  }
 0x15d   : > { %s715_s28 = smov 4  }
 0x15e   : > { %488 = dma.vmem_to_hbm [thread:$0]  (%p771_p4), %s310_s7, 128, %s312_s8, %s295_s16, %s713_s15, %s714_s18, %s715_s28  }
 0x15f PF: > { %p505_p12 = scmp.ge.s32.totalorder %s707_s14, 2  ;;  %s326_s29 = sand.u32 1, %s687_s9  }
 0x160   : > { %s327_s30 = scalar_lea.sflag [#allocation5], %s326_s29 }
 0x161   : > { %p498_p13 = pnand %p505_p12, %p778_p8 }
 0x163   : > { %p499_p0 = pneg %p498_p13 }
 0x165   : > { %682 = dma.done.wait (%p499_p0), %s327_s30, 128  }
 0x166   : > { %684 = vsyncadd (%p499_p0), %s327_s30, 4294967168  ;;  %s17_s14 = sadd.s32 1, %s707_s14   ;;  %s872_s9 = smov %s691_s10 }
 0x167   : > { %p14_p1 = scmp.ge.s32.totalorder %s17_s14, 4   ;;  %s873_s10 = smov %s695_s11 }
 0x168   : > { %s874_s11 = smov %s784_s22  ;;  %s875_s12 = smov %s703_s13 }
 0x169   : > { %s876_s13 = smov %s878_s17  ;;  %16 = sbr.rel (!%p14_p1) target bundleno = 6 (0x6), region = 83 }
 0x16e   :  { %333 = vsyncpa [#allocation4], 1 }
 0x16f   :  { %335 = vsyncpa [#allocation4 + $0x1], 1 }
 0x170   :  { %336 = vsyncpa [#allocation7], 1 }
 0x171   :  { %337 = vsyncpa [#allocation5], 1 }
 0x172   :  { %339 = vsyncpa [#allocation5 + $0x1], 1 }

</bundles_post_ra>
